<compile_context>
chip_gen: v6e
topology: v6e:2x2x1
jax: 0.10.0
libtpu: 0.0.40
codegen_flags: <defaults>
</compile_context>

<pallas_src>
import functools

import jax
import jax.numpy as jnp
from jax.experimental import pallas as pl
from jax.experimental.pallas import tpu as pltpu


def _round_up(v, m):
    return (v + m - 1) // m * m


# ----------------------------------------------------------------------------
# Prologue: fused single-pass weight statistics (sum, sum of squares).
# Runs on the zero-padded weight; zero padding contributes 0 to both sums, so
# mean / var are recovered exactly with the *real* element count in the wrapper.
# ----------------------------------------------------------------------------
def _stats_kernel(w_ref, out_ref, acc_ref):
    i = pl.program_id(0)
    j = pl.program_id(1)

    @pl.when((i == 0) & (j == 0))
    def _():
        acc_ref[0] = jnp.float32(0.0)
        acc_ref[1] = jnp.float32(0.0)

    w = w_ref[...].astype(jnp.float32)
    acc_ref[0] = acc_ref[0] + jnp.sum(w)
    acc_ref[1] = acc_ref[1] + jnp.sum(w * w)

    @pl.when((i == pl.num_programs(0) - 1) & (j == pl.num_programs(1) - 1))
    def _():
        out_ref[0] = acc_ref[0]
        out_ref[1] = acc_ref[1]


# ----------------------------------------------------------------------------
# Main kernel: per-tile weight centering + hard-shrink + tiled matmul.
# scalars_ref (SMEM) holds [mean(W), denom].
# ----------------------------------------------------------------------------
def _sparse_fc_kernel(scalars_ref, x_ref, w_ref, b_ref, o_ref, acc_ref, *, mm_dtype):
    k = pl.program_id(2)

    @pl.when(k == 0)
    def _():
        acc_ref[...] = jnp.zeros_like(acc_ref)

    mean_w = scalars_ref[0]
    denom = scalars_ref[1]

    # centered weight tile; hard-shrink without the divide/multiply round-trip:
    #   denom * hardshrink(wc / denom, 1)  ==  wc where |wc| > denom else 0
    wc = w_ref[...].astype(jnp.float32) - mean_w
    w_final = jnp.where(jnp.abs(wc) > denom, wc, 0.0)

    # NT contraction on the MXU: x (tm, tk) . W' (tn, tk) contracting on dim 1,
    # no transposed tensor materialized, f32 accumulation.
    acc_ref[...] += jax.lax.dot_general(
        x_ref[...].astype(mm_dtype),
        w_final.astype(mm_dtype),
        dimension_numbers=(((1,), (1,)), ((), ())),
        preferred_element_type=jnp.float32,
    )

    @pl.when(k == pl.num_programs(2) - 1)
    def _():
        o_ref[...] = (acc_ref[...] + b_ref[...]).astype(o_ref.dtype)


def sparse_fc(x, weight, bias, r=0.5, *, tm=256, tn=512, tk=512, use_bf16=False):
    """x: (B, in_f), weight: (out_f, in_f), bias: (out_f,) -> (B, out_f)."""
    batch, in_f = x.shape
    out_f, in_f2 = weight.shape
    assert in_f == in_f2 and bias.shape == (out_f,)

    # Hardware-aligned tile sizes (clipped to the padded problem dims):
    #   batch tile multiple of 8 (sublanes), out/in tiles multiples of 128 (lanes)
    #   so the output store is lane-dense and all blocks satisfy the (8,128) rule.
    tm = min(tm, _round_up(batch, 8))
    tn = min(tn, _round_up(out_f, 128))
    tk = min(tk, _round_up(in_f, 128))

    b_p = _round_up(batch, tm)
    out_p = _round_up(out_f, tn)
    in_p = _round_up(in_f, tk)

    x_p = jnp.pad(x.astype(jnp.float32), ((0, b_p - batch), (0, in_p - in_f)))
    w_p = jnp.pad(weight.astype(jnp.float32), ((0, out_p - out_f), (0, in_p - in_f)))
    b_p2d = jnp.pad(bias.astype(jnp.float32), (0, out_p - out_f)).reshape(1, out_p)

    # ---- prologue: one pass over W for sum / sumsq -------------------------
    stats = pl.pallas_call(
        _stats_kernel,
        out_shape=jax.ShapeDtypeStruct((2,), jnp.float32),
        grid_spec=pltpu.PrefetchScalarGridSpec(
            num_scalar_prefetch=0,
            grid=(out_p // tn, in_p // tk),
            in_specs=[pl.BlockSpec((tn, tk), lambda i, j: (i, j))],
            out_specs=pl.BlockSpec(memory_space=pltpu.MemorySpace.SMEM),
            scratch_shapes=[pltpu.SMEM((2,), jnp.float32)],
        ),
        compiler_params=pltpu.CompilerParams(
            dimension_semantics=("arbitrary", "arbitrary"),
            vmem_limit_bytes=32 * 1024 * 1024,
        ),
    )(w_p)

    n = out_f * in_f  # real (unpadded) element count
    s, ssq = stats[0], stats[1]
    mean_w = s / n
    var = (ssq - n * mean_w * mean_w) / (n - 1)          # unbiased (ddof=1)
    std = jnp.sqrt(jnp.maximum(var, 0.0))
    rr = jnp.clip(jnp.asarray(r, jnp.float32), 0.0, 5.0)
    denom = rr * std + jnp.float32(1e-6)
    scalars = jnp.stack([mean_w, denom]).astype(jnp.float32)  # (2,) -> SMEM

    # ---- main kernel: tiled sparsified matmul ------------------------------
    mm_dtype = jnp.bfloat16 if use_bf16 else jnp.float32
    flops = 2 * b_p * out_p * in_p
    bytes_accessed = 4 * (b_p * in_p + out_p * in_p + b_p * out_p + out_p)

    out_padded = pl.pallas_call(
        functools.partial(_sparse_fc_kernel, mm_dtype=mm_dtype),
        out_shape=jax.ShapeDtypeStruct((b_p, out_p), x.dtype),
        grid_spec=pltpu.PrefetchScalarGridSpec(
            num_scalar_prefetch=0,
            grid=(b_p // tm, out_p // tn, in_p // tk),
            in_specs=[
                pl.BlockSpec(memory_space=pltpu.MemorySpace.SMEM),   # [mean, denom]
                pl.BlockSpec((tm, tk), lambda i, j, k: (i, k)),      # x tile
                pl.BlockSpec((tn, tk), lambda i, j, k: (j, k)),      # weight tile
                pl.BlockSpec((1, tn), lambda i, j, k: (0, j)),       # bias tile
            ],
            out_specs=pl.BlockSpec((tm, tn), lambda i, j, k: (i, j)),
            scratch_shapes=[pltpu.VMEM((tm, tn), jnp.float32)],
        ),
        compiler_params=pltpu.CompilerParams(
            dimension_semantics=("parallel", "parallel", "arbitrary"),
            vmem_limit_bytes=32 * 1024 * 1024,
        ),
        cost_estimate=pl.CostEstimate(
            flops=flops, transcendentals=0, bytes_accessed=bytes_accessed),
    )(scalars, x_p, w_p, b_p2d)

    return out_padded[:batch, :out_f]


if __name__ == "__main__":
    key = jax.random.PRNGKey(0)
    k_x, k_w, k_b = jax.random.split(key, 3)

    batch, in_f, out_f = 4, 32, 16
    x = jax.random.normal(k_x, (batch, in_f), dtype=jnp.float32)

    # deterministic nn.Linear-style init: U(-1/sqrt(in_f), 1/sqrt(in_f))
    bound = 1.0 / (in_f ** 0.5)
    weight = jax.random.uniform(k_w, (out_f, in_f), jnp.float32, -bound, bound)
    bias = jax.random.uniform(k_b, (out_f,), jnp.float32, -bound, bound)

    out = sparse_fc(x, weight, bias, r=0.5)
    out = jax.block_until_ready(out)

    # pure-JAX reference mimicking the PyTorch forward
    wc = weight - jnp.mean(weight)
    l = jnp.clip(jnp.float32(0.5), 0.0, 5.0) * jnp.std(wc, ddof=1)
    denom = l + 1e-6
    nw = wc / denom
    sw = jnp.where(jnp.abs(nw) > 1.0, nw, 0.0)
    ref = x @ (denom * sw).T + bias

    assert out.shape == (batch, out_f)
    assert jnp.allclose(out, ref, atol=2e-5, rtol=2e-5), (
        "mismatch vs reference, max abs err = %s" % jnp.max(jnp.abs(out - ref)))

    # TODO(synk): the in-place mutation of fc.weight.data (persistent centering side
    # effect across calls) and the SparseSTE straight-through backward are training-time
    # semantics with no functional forward-only equivalent; forward output is exact.
    print("KERNEL_OK")
</pallas_src>

<mosaic_0001>
module attributes {stable_mosaic.version = 11 : i64} {
  func.func @_stats_kernel(%arg0: i32, %arg1: i32, %arg2: memref<128x128xf32, #tpu.memory_space<vmem>>, %arg3: memref<2xf32, #tpu.memory_space<smem>>, %arg4: memref<2xf32, #tpu.memory_space<smem>>) attributes {dimension_semantics = [#tpu.dimension_semantics<arbitrary>, #tpu.dimension_semantics<arbitrary>], iteration_bounds = array<i64: 1, 1>, scalar_prefetch = 0 : i64, scratch_operands = 1 : i64, tpu.core_type = #tpu.core_type<tc>, window_params = [{transform_indices = @transform_0, window_bounds = array<i64: 128, 128>}, {transform_indices = @transform_1, window_bounds = array<i64: 2>}]} {
    %c0_i32 = arith.constant 0 : i32
    %0 = arith.cmpi eq, %arg0, %c0_i32 : i32
    %c0_i32_0 = arith.constant 0 : i32
    %1 = arith.cmpi eq, %arg1, %c0_i32_0 : i32
    %2 = arith.andi %0, %1 : i1
    %3 = arith.extui %2 : i1 to i32
    %c0_i32_1 = arith.constant 0 : i32
    %4 = arith.cmpi ne, %3, %c0_i32_1 : i32
    scf.if %4 {
      %cst_10 = arith.constant 0.000000e+00 : f32
      %c0_11 = arith.constant 0 : index
      %26 = memref.load %arg4[%c0_11] : memref<2xf32, #tpu.memory_space<smem>>
      memref.store %cst_10, %arg4[%c0_11] : memref<2xf32, #tpu.memory_space<smem>>
      %cst_12 = arith.constant 0.000000e+00 : f32
      %c1_13 = arith.constant 1 : index
      %27 = memref.load %arg4[%c1_13] : memref<2xf32, #tpu.memory_space<smem>>
      memref.store %cst_12, %arg4[%c1_13] : memref<2xf32, #tpu.memory_space<smem>>
    } else {
    }
    %c0 = arith.constant 0 : index
    %c0_2 = arith.constant 0 : index
    %5 = vector.load %arg2[%c0, %c0_2] : memref<128x128xf32, #tpu.memory_space<vmem>>, vector<128x128xf32>
    %c0_3 = arith.constant 0 : index
    %6 = memref.load %arg4[%c0_3] : memref<2xf32, #tpu.memory_space<smem>>
    %7 = vector.shape_cast %5 : vector<128x128xf32> to vector<1x128x128xf32>
    %cst = arith.constant dense<0.000000e+00> : vector<1xf32>
    %8 = vector.multi_reduction <add>, %7, %cst [1, 2] : vector<1x128x128xf32> to vector<1xf32>
    %9 = vector.shape_cast %8 : vector<1xf32> to vector<1x1x1xf32>
    %10 = vector.extract %9[0, 0, 0] : f32 from vector<1x1x1xf32>
    %11 = arith.addf %6, %10 : f32
    %c0_4 = arith.constant 0 : index
    %12 = memref.load %arg4[%c0_4] : memref<2xf32, #tpu.memory_space<smem>>
    memref.store %11, %arg4[%c0_4] : memref<2xf32, #tpu.memory_space<smem>>
    %c1 = arith.constant 1 : index
    %13 = memref.load %arg4[%c1] : memref<2xf32, #tpu.memory_space<smem>>
    %14 = arith.mulf %5, %5 : vector<128x128xf32>
    %15 = vector.shape_cast %14 : vector<128x128xf32> to vector<1x128x128xf32>
    %cst_5 = arith.constant dense<0.000000e+00> : vector<1xf32>
    %16 = vector.multi_reduction <add>, %15, %cst_5 [1, 2] : vector<1x128x128xf32> to vector<1xf32>
    %17 = vector.shape_cast %16 : vector<1xf32> to vector<1x1x1xf32>
    %18 = vector.extract %17[0, 0, 0] : f32 from vector<1x1x1xf32>
    %19 = arith.addf %13, %18 : f32
    %c1_6 = arith.constant 1 : index
    %20 = memref.load %arg4[%c1_6] : memref<2xf32, #tpu.memory_space<smem>>
    memref.store %19, %arg4[%c1_6] : memref<2xf32, #tpu.memory_space<smem>>
    %c0_i32_7 = arith.constant 0 : i32
    %21 = arith.cmpi eq, %arg0, %c0_i32_7 : i32
    %c0_i32_8 = arith.constant 0 : i32
    %22 = arith.cmpi eq, %arg1, %c0_i32_8 : i32
    %23 = arith.andi %21, %22 : i1
    %24 = arith.extui %23 : i1 to i32
    %c0_i32_9 = arith.constant 0 : i32
    %25 = arith.cmpi ne, %24, %c0_i32_9 : i32
    scf.if %25 {
      %c0_10 = arith.constant 0 : index
      %26 = memref.load %arg4[%c0_10] : memref<2xf32, #tpu.memory_space<smem>>
      %c0_11 = arith.constant 0 : index
      %27 = memref.load %arg3[%c0_11] : memref<2xf32, #tpu.memory_space<smem>>
      memref.store %26, %arg3[%c0_11] : memref<2xf32, #tpu.memory_space<smem>>
      %c1_12 = arith.constant 1 : index
      %28 = memref.load %arg4[%c1_12] : memref<2xf32, #tpu.memory_space<smem>>
      %c1_13 = arith.constant 1 : index
      %29 = memref.load %arg3[%c1_13] : memref<2xf32, #tpu.memory_space<smem>>
      memref.store %28, %arg3[%c1_13] : memref<2xf32, #tpu.memory_space<smem>>
    } else {
    }
    return
  }
  func.func @transform_0(%arg0: i32, %arg1: i32) -> (i32, i32) {
    %c0_i32 = arith.constant 0 : i32
    return %arg0, %arg1 : i32, i32
  }
  func.func @transform_1(%arg0: i32, %arg1: i32) -> i32 {
    %c0_i32 = arith.constant 0 : i32
    %c0_i32_0 = arith.constant 0 : i32
    return %c0_i32 : i32
  }
}

</mosaic_0001>

<bundles_post_ra>
// kernel: tpu_custom_call.1
= control target key start
LH: loop header
LB: loop body
LE: loop exit
PB: predicated region body
PF: predicated region fallthrough
CT: control target
= control target key end

     0   :  { %6 = vsyncpa [#allocation4], 0  ;;  %s205_s0 = inlined_call_operand.hbm [shape: f32[128,128], index: 0, kind: input, shape index: {}]   ;;  %s206_s1 = inlined_call_operand.hbm [shape: f32[2], index: 1, kind: output, shape index: {}]  }
   0x1   :  { %7 = vsyncpa [#allocation5], 0  ;;  %s185_s6 = smov [#allocation3]  }
   0x2   :  { %s13_s7 = sshll.u32 %s185_s6, 4  ;;  %s14_s7 = int_to_ptr.vmem [resolvable:$true] %s13_s7 }
   0x3   :  { %s161_s8 = scalar_lea.vmem %s14_s7, 2048  ;;  %p166_p1 = scmp.lt.s32.totalorder %s14_s7, %s14_s7 }
   0x4   :  { %p162_p0 = scmp.ne.s32.totalorder %s14_s7, %s161_s8  ;;  %p167_p2 = scmp.lt.s32.totalorder %s161_s8, %s161_s8 }
   0x6   :  { %p168_p3 = por %p167_p2, %p166_p1 }
   0x8   :  { %p169_p4 = pnand %p168_p3, %p162_p0 }
   0xa   :  { %172 = shalt.err (!%p169_p4)
}
   0xb   :  { %s186_s9 = smov 128   ;;  %s187_s10 = smov 8  }
   0xc   :  { %19 = dma.hbm_to_vmem [thread:$0]  %s205_s0, 2048, %s14_s7, [#allocation4], %s186_s9, %s186_s9, %s187_s10  }
   0xd   :  { %181 = dma.done.wait [#allocation4], 2048  }
   0xe   :  { %182 = vsyncadd [#allocation4], 4294965248  ;;  %v33_v0 = vld [vmem:[#allocation3] sm:$0xff]  ;;  %v34_v1 = vld [vmem:[#allocation3 + $0x8] sm:$0xff]  ;;  %s188_s14 = smov [#allocation6]  }
   0xf   :  { %v35_v2 = vld [vmem:[#allocation3 + $0x10] sm:$0xff]  ;;  %v50_v3 = vadd.f32 %v34_v1, %v33_v0  ;;  %v78_v4 = vmul.f32 %v33_v0, %v33_v0  ;;  %v79_v5 = vmul.f32 %v34_v1, %v34_v1  ;;  %v36_v6 = vld [vmem:[#allocation3 + $0x18] sm:$0xff]  ;;  %v37_v9 = vld [vmem:[#allocation3 + $0x20] sm:$0xff] }
  0x10   :  { %v80_v7 = vmul.f32 %v35_v2, %v35_v2  ;;  %v81_v10 = vmul.f32 %v36_v6, %v36_v6  ;;  %v38_v13 = vld [vmem:[#allocation3 + $0x28] sm:$0xff]  ;;  %v82_v14 = vmul.f32 %v37_v9, %v37_v9  ;;  %v39_v17 = vld [vmem:[#allocation3 + $0x30] sm:$0xff]  ;;  %v40_v21 = vld [vmem:[#allocation3 + $0x38] sm:$0xff] }
  0x11   :  { %v51_v8 = vadd.f32 %v50_v3, %v35_v2  ;;  %v94_v11 = vadd.f32 %v79_v5, %v78_v4  ;;  %v83_v18 = vmul.f32 %v38_v13, %v38_v13  ;;  %v84_v22 = vmul.f32 %v39_v17, %v39_v17  ;;  %v41_v25 = vld [vmem:[#allocation3 + $0x40] sm:$0xff]  ;;  %v42_v29 = vld [vmem:[#allocation3 + $0x48] sm:$0xff]  ;;  %v43_v33 = vld [vmem:[#allocation3 + $0x50] sm:$0xff] }
  0x12   :  { %v85_v26 = vmul.f32 %v40_v21, %v40_v21  ;;  %v86_v30 = vmul.f32 %v41_v25, %v41_v25  ;;  %v87_v34 = vmul.f32 %v42_v29, %v42_v29  ;;  %v44_v37 = vld [vmem:[#allocation3 + $0x58] sm:$0xff]  ;;  %v88_v38 = vmul.f32 %v43_v33, %v43_v33  ;;  %v45_v41 = vld [vmem:[#allocation3 + $0x60] sm:$0xff]  ;;  %v46_v45 = vld [vmem:[#allocation3 + $0x68] sm:$0xff] }
  0x13   :  { %v52_v12 = vadd.f32 %v51_v8, %v36_v6  ;;  %v95_v15 = vadd.f32 %v94_v11, %v80_v7  ;;  %v89_v42 = vmul.f32 %v44_v37, %v44_v37  ;;  %v90_v46 = vmul.f32 %v45_v41, %v45_v41  ;;  %v47_v49 = vld [vmem:[#allocation3 + $0x70] sm:$0xff]  ;;  %v48_v53 = vld [vmem:[#allocation3 + $0x78] sm:$0xff] }
  0x14   :  { %v91_v50 = vmul.f32 %v46_v45, %v46_v45  ;;  %v92_v54 = vmul.f32 %v47_v49, %v47_v49  ;;  %v93_v57 = vmul.f32 %v48_v53, %v48_v53 }
  0x15   :  { %v53_v16 = vadd.f32 %v52_v12, %v37_v9  ;;  %v96_v19 = vadd.f32 %v95_v15, %v81_v10 }
  0x17   :  { %v54_v20 = vadd.f32 %v53_v16, %v38_v13  ;;  %v97_v23 = vadd.f32 %v96_v19, %v82_v14 }
  0x19   :  { %v55_v24 = vadd.f32 %v54_v20, %v39_v17  ;;  %v98_v27 = vadd.f32 %v97_v23, %v83_v18 }
  0x1b   :  { %v56_v28 = vadd.f32 %v55_v24, %v40_v21  ;;  %v99_v31 = vadd.f32 %v98_v27, %v84_v22 }
  0x1d   :  { %v57_v32 = vadd.f32 %v56_v28, %v41_v25  ;;  %v100_v35 = vadd.f32 %v99_v31, %v85_v26 }
  0x1f   :  { %v58_v36 = vadd.f32 %v57_v32, %v42_v29  ;;  %v101_v39 = vadd.f32 %v100_v35, %v86_v30 }
  0x21   :  { %v59_v40 = vadd.f32 %v58_v36, %v43_v33  ;;  %v102_v43 = vadd.f32 %v101_v39, %v87_v34 }
  0x23   :  { %v60_v44 = vadd.f32 %v59_v40, %v44_v37  ;;  %v103_v47 = vadd.f32 %v102_v43, %v88_v38 }
  0x25   :  { %v61_v48 = vadd.f32 %v60_v44, %v45_v41  ;;  %v104_v51 = vadd.f32 %v103_v47, %v89_v42 }
  0x27   :  { %v62_v52 = vadd.f32 %v61_v48, %v46_v45  ;;  %v105_v55 = vadd.f32 %v104_v51, %v90_v46 }
  0x29   :  { %v63_v56 = vadd.f32 %v62_v52, %v47_v49  ;;  %v106_v58 = vadd.f32 %v105_v55, %v91_v50 }
  0x2b   :  { %v64_v59 = vadd.f32 %v63_v56, %v48_v53  ;;  %v107_v60 = vadd.f32 %v106_v58, %v92_v54 }
  0x2d   :  { %65 = vadd.xlane.f32.xlu0 %v64_v59  ;;  %v108_v61 = vadd.f32 %v107_v60, %v93_v57 }
  0x31   :  { %109 = vadd.xlane.f32.xlu0 %v108_v61 }
  0xb6   :  { %v66_v62 = vpop.xlane.xlu0 %65 }
  0xb7   :  { %v67_v63 = vrot.slane %v66_v62, 4 }
  0xb9   :  { %v68_v0 = vadd.f32 %v67_v63, %v66_v62 }
  0xba   :  { %v110_v1 = vpop.xlane.xlu0 %109 }
  0xbb   :  { %v69_v2 = vrot.slane %v68_v0, 2  ;;  %v111_v3 = vrot.slane %v110_v1, 4 }
  0xbd   :  { %v112_v4 = vadd.f32 %v111_v3, %v110_v1  ;;  %v70_v5 = vadd.f32 %v69_v2, %v68_v0 }
  0xbf   :  { %v113_v6 = vrot.slane %v112_v4, 2  ;;  %v71_v7 = vrot.slane %v70_v5, 1 }
  0xc1   :  { %v114_v8 = vadd.f32 %v113_v6, %v112_v4  ;;  %v72_v9 = vadd.f32 %v71_v7, %v70_v5 }
  0xc3   :  { %145 = vpush %v72_v9  ;;  %v115_v10 = vrot.slane %v114_v8, 1 }
  0xc5   :  { %v116_v11 = vadd.f32 %v115_v10, %v114_v8 }
  0xc7   :  { %147 = vpush %v116_v11 }
  0xf4   :  { %s146_s0 = spop %145 }
  0xf5   :  { %125 = sst [smem:[#allocation6]] %s146_s0 }
  0xf8   :  { %s148_s13 = spop %147 }
  0xf9   :  { %128 = sst [smem:[#allocation6 + $0x1]] %s148_s13 }
  0xfa   :  { %136 = dma.smem_to_hbm %s188_s14, 16, %s206_s1, [#allocation5]  }
  0xfb   :  { %183 = dma.done.wait [#allocation5], 16  }
  0xfc   :  { %184 = vsyncadd [#allocation5], 4294967280 }
  0xfd   :  { %140 = sfence }
  0xfe   :  { %141 = vsyncpa [#allocation4], 1 }
  0xff   :  { %142 = vsyncpa [#allocation5], 1 }

</bundles_post_ra>
